<compile_context>
chip_gen: v7x
topology: tpu7x:2x2x1
jax: 0.10.0
libtpu: 0.0.40
codegen_flags: <defaults>
</compile_context>

<pallas_src>
import functools
import math

import jax
import jax.numpy as jnp
import numpy as np
from jax import lax
from jax.experimental import pallas as pl
from jax.experimental.pallas import tpu as pltpu  # noqa: F401  (TPU backend assumed)


def _round_up(n, m):
    return ((n + m - 1) // m) * m


# ----------------------------------------------------------------------------
# Fused Pallas kernel: projections + cross-attention + out-projection
# ----------------------------------------------------------------------------
def _fused_feature_fusion_kernel(
    ego_ref, map_ref, other_ref, pred_ref,
    w_ref, bias_ref, wo_ref, bo_ref,
    qb_ref, kb_ref,
    out_ref, *, D, H, dh, PQ, Fin):
    f32 = jnp.float32
    neg_big = jnp.float32(-1e30)   # safe for f32/bf16; re-derive if dtype changes

    # ---- fused projections (composed weights; softmax 1/sqrt(dh) folded into q) ----
    # Static sublane slices of the packed weight / bias stacks are free views.
    q     = jnp.dot(ego_ref[...],   w_ref[0 * D:1 * D, :],
                    preferred_element_type=f32) + bias_ref[0:1, :]
    k_map = jnp.dot(map_ref[...],   w_ref[1 * D:2 * D, :],
                    preferred_element_type=f32) + bias_ref[1:2, :]
    k_oth = jnp.dot(other_ref[...], w_ref[2 * D:3 * D, :],
                    preferred_element_type=f32) + bias_ref[2:3, :]
    k_prd = jnp.dot(pred_ref[...],  w_ref[3 * D:3 * D + Fin, :],
                    preferred_element_type=f32) + bias_ref[3:4, :]
    v_map = jnp.dot(map_ref[...],   w_ref[3 * D + Fin:4 * D + Fin, :],
                    preferred_element_type=f32) + bias_ref[4:5, :]
    v_oth = jnp.dot(other_ref[...], w_ref[4 * D + Fin:5 * D + Fin, :],
                    preferred_element_type=f32) + bias_ref[5:6, :]
    v_prd = jnp.dot(pred_ref[...],  w_ref[5 * D + Fin:5 * D + 2 * Fin, :],
                    preferred_element_type=f32) + bias_ref[6:7, :]

    k = jnp.concatenate([k_map, k_oth, k_prd], axis=0)   # (PK, D) sublane-aligned concat
    v = jnp.concatenate([v_map, v_oth, v_prd], axis=0)   # (PK, D)

    # ---- query-side head expansion (PQ << PK, so expand Q, not K/V) ----
    # head-of-row / head-of-lane masks generated in-kernel (iota + compares, no div).
    r_idx = lax.broadcasted_iota(jnp.int32, (H * PQ, D), 0)
    d_idx = lax.broadcasted_iota(jnp.int32, (H * PQ, D), 1)
    head_r = jnp.zeros((H * PQ, D), jnp.int32)
    head_d = jnp.zeros((H * PQ, D), jnp.int32)
    for h in range(1, H):                                  # static unroll, VPU filler
        head_r = head_r + (r_idx >= h * PQ).astype(jnp.int32)
        head_d = head_d + (d_idx >= h * dh).astype(jnp.int32)
    qmask = head_r == head_d                               # (H*PQ, D)

    q_rep = jnp.concatenate([q] * H, axis=0)               # (H*PQ, D)
    q_m = jnp.where(qmask, q_rep, 0.0)

    # ---- per-(head, query) scores; batch mask from tiny int32 segment ids ----
    s = lax.dot_general(q_m, k, (((1,), (1,)), ((), ())),
                        preferred_element_type=f32)        # (H*PQ, PK)
    match = qb_ref[...] == kb_ref[...]                     # (H*PQ,1) vs (1,PK) -> broadcast
    s = jnp.where(match, s, neg_big)

    # per-row softmax == per-head per-query softmax (exact parity with reference)
    m = jnp.max(s, axis=-1, keepdims=True)
    p = jnp.exp(s - m)
    l = jnp.sum(p, axis=-1, keepdims=True)                 # (H*PQ, 1) denominators

    o_rows = jnp.dot(p, v, preferred_element_type=f32)     # (H*PQ, D)
    o_rows = jnp.where(qmask, o_rows * pl.reciprocal(l, approx=True), 0.0)

    # recombine heads: head h's dh lanes come from its own PQ-row block
    o = o_rows[0:PQ, :]
    for h in range(1, H):
        o = o + o_rows[h * PQ:(h + 1) * PQ, :]

    # ---- out-projection into a 128-lane-dense slab (unmasked full-vreg store) ----
    out_ref[...] = (jnp.dot(o, wo_ref[...], preferred_element_type=f32)
                    + bo_ref[...]).astype(out_ref.dtype)


# ----------------------------------------------------------------------------
# One-time weight composition (hoisted out of the per-call hot path)
# ----------------------------------------------------------------------------
def prepare_params(params):
    f32 = jnp.float32
    D = params["wq"].shape[0]
    H = params["num_heads"]
    dh = D // H
    scale = 1.0 / math.sqrt(dh)
    Fin = params["w_pred_enc"].shape[0]
    Dp = _round_up(D, 128)
    assert D % 8 == 0 and Fin % 8 == 0, "packed weight stack needs 8-aligned slices"

    wq_s = (params["wq"] * scale).astype(f32)
    bq_s = (params["bq"] * scale).astype(f32)

    def fold(w_src, b_src, w_attn, b_attn):
        return (w_src @ w_attn).astype(f32), (b_src @ w_attn + b_attn).astype(f32)

    wk_map, bk_map = fold(params["w_map"], params["b_map"], params["wk"], params["bk"])
    wk_oth, bk_oth = fold(params["w_other"], params["b_other"], params["wk"], params["bk"])
    wv_map, bv_map = fold(params["w_map"], params["b_map"], params["wv"], params["bv"])
    wv_oth, bv_oth = fold(params["w_other"], params["b_other"], params["wv"], params["bv"])

    w_pred_chain = params["w_pred_enc"] @ params["w_predp"]          # (Fin, D)
    b_pred_chain = params["b_pred_enc"] @ params["w_predp"] + params["b_predp"]
    wk_prd, bk_prd = fold(w_pred_chain, b_pred_chain, params["wk"], params["bk"])
    wv_prd, bv_prd = fold(w_pred_chain, b_pred_chain, params["wv"], params["bv"])

    # one packed weight stack (5D + 2Fin rows) and one packed bias block (8 rows)
    w_stack = jnp.concatenate(
        [wq_s, wk_map, wk_oth, wk_prd, wv_map, wv_oth, wv_prd], axis=0).astype(f32)
    bias_pack = jnp.stack(
        [bq_s, bk_map, bk_oth, bk_prd, bv_map, bv_oth, bv_prd,
         jnp.zeros((D,), f32)], axis=0).astype(f32)

    wo_pad = jnp.pad(params["wo"], ((0, 0), (0, Dp - D))).astype(f32)
    bo_pad = jnp.pad(params["bo"].reshape(1, D), ((0, 0), (0, Dp - D))).astype(f32)

    return dict(w_stack=w_stack, bias_pack=bias_pack, wo_pad=wo_pad, bo_pad=bo_pad,
                D=D, H=H, dh=dh, Fin=Fin, Dp=Dp)


# ----------------------------------------------------------------------------
# Per-call wrapper: pad activations, build tiny segment-id vectors, launch once
# ----------------------------------------------------------------------------
def feature_fusion_forward(prep, ego_instance_feature, map_instance_feature,
                           other_instance_feature, traj_anchors, prediction, target):
    # traj_anchors / target are unused by the PyTorch forward; kept for parity.
    del traj_anchors, target
    f32 = jnp.float32
    D, H, dh, Fin, Dp = prep["D"], prep["H"], prep["dh"], prep["Fin"], prep["Dp"]

    ego = ego_instance_feature
    map_f = map_instance_feature
    other_f = other_instance_feature

    B, Lq, _ = ego.shape
    Lm = map_f.shape[1]
    Lo = other_f.shape[1]
    La = prediction.shape[1]
    assert prediction.shape[2] * prediction.shape[3] == Fin

    PQ = _round_up(B * Lq, 8)
    Pm = _round_up(B * Lm, 8)
    Po = _round_up(B * Lo, 8)
    Pa = _round_up(B * La, 8)
    PK = Pm + Po + Pa

    def pad_rows(x, rows):
        return jnp.pad(x.astype(f32), ((0, rows - x.shape[0]), (0, 0)))

    ego_flat = pad_rows(ego.reshape(B * Lq, D), PQ)
    map_flat = pad_rows(map_f.reshape(B * Lm, D), Pm)
    other_flat = pad_rows(other_f.reshape(B * Lo, D), Po)
    pred_flat = pad_rows(prediction.reshape(B * La, Fin), Pa)

    # tiny int32 segment-id vectors (shape-dependent only; constants under jit)
    def key_ids(L, rows):
        ids = np.full((rows,), -1, np.int32)                 # -1 => padded key row
        ids[: B * L] = np.repeat(np.arange(B, dtype=np.int32), L)
        return ids

    kb = np.concatenate([key_ids(Lm, Pm), key_ids(Lo, Po),
                         key_ids(La, Pa)]).reshape(1, PK)
    qb1 = np.full((PQ,), -2, np.int32)                        # -2 => padded query row
    qb1[: B * Lq] = np.repeat(np.arange(B, dtype=np.int32), Lq)
    qb = np.tile(qb1, H).reshape(H * PQ, 1)

    kernel = functools.partial(_fused_feature_fusion_kernel,
                               D=D, H=H, dh=dh, PQ=PQ, Fin=Fin)
    out = pl.pallas_call(
        kernel,
        out_shape=jax.ShapeDtypeStruct((PQ, Dp), f32),
    )(ego_flat, map_flat, other_flat, pred_flat,
      prep["w_stack"], prep["bias_pack"], prep["wo_pad"], prep["bo_pad"],
      jnp.asarray(qb), jnp.asarray(kb))

    return out[: B * Lq, :D].reshape(B, Lq, D)


# ----------------------------------------------------------------------------
# Pure-JAX reference (for self-check)
# ----------------------------------------------------------------------------
def _ref_forward(params, ego, map_f, other_f, traj_anchors, prediction, target):
    bs, num_agents = prediction.shape[:2]
    pred_flat = prediction.reshape(bs, num_agents, -1)
    lin = lambda x, w, b: x @ w + b
    pred_feature = lin(pred_flat, params["w_pred_enc"], params["b_pred_enc"])
    ctx = jnp.concatenate(
        [lin(map_f, params["w_map"], params["b_map"]),
         lin(other_f, params["w_other"], params["b_other"]),
         lin(pred_feature, params["w_predp"], params["b_predp"])], axis=1)
    D = ego.shape[-1]
    H = params["num_heads"]
    dh = D // H
    q = lin(ego, params["wq"], params["bq"])
    k = lin(ctx, params["wk"], params["bk"])
    v = lin(ctx, params["wv"], params["bv"])
    sh = lambda x: x.reshape(x.shape[0], x.shape[1], H, dh).transpose(0, 2, 1, 3)
    qh, kh, vh = sh(q), sh(k), sh(v)
    s = jnp.einsum("bhqd,bhkd->bhqk", qh, kh) / math.sqrt(dh)
    attn = jax.nn.softmax(s, axis=-1)
    o = jnp.einsum("bhqk,bhkd->bhqd", attn, vh)
    o = o.transpose(0, 2, 1, 3).reshape(ego.shape[0], ego.shape[1], D)
    return lin(o, params["wo"], params["bo"])


# ----------------------------------------------------------------------------
# Main
# ----------------------------------------------------------------------------
if __name__ == "__main__":
    # small, forward-consistent shapes
    embed_dim = 32
    num_heads = 4
    future_steps = 8
    bs = 2
    num_agents = 6
    num_map = 10
    num_other = 6
    num_ego_q = 4

    key = jax.random.PRNGKey(0)
    keys = jax.random.split(key, 24)
    ki = iter(keys)

    def w(shape, k):
        return jax.random.normal(k, shape, dtype=jnp.float32) * 0.05

    params = {
        "num_heads": num_heads,
        # prediction_encoder: Linear(future_steps*2 -> embed_dim)  (in, out) layout
        "w_pred_enc": w((future_steps * 2, embed_dim), next(ki)),
        "b_pred_enc": w((embed_dim,), next(ki)),
        # map_proj / other_proj / pred_proj
        "w_map": w((embed_dim, embed_dim), next(ki)),
        "b_map": w((embed_dim,), next(ki)),
        "w_other": w((embed_dim, embed_dim), next(ki)),
        "b_other": w((embed_dim,), next(ki)),
        "w_predp": w((embed_dim, embed_dim), next(ki)),
        "b_predp": w((embed_dim,), next(ki)),
        # MultiheadAttention in_proj (q/k/v) and out_proj
        "wq": w((embed_dim, embed_dim), next(ki)),
        "bq": w((embed_dim,), next(ki)),
        "wk": w((embed_dim, embed_dim), next(ki)),
        "bk": w((embed_dim,), next(ki)),
        "wv": w((embed_dim, embed_dim), next(ki)),
        "bv": w((embed_dim,), next(ki)),
        "wo": w((embed_dim, embed_dim), next(ki)),
        "bo": w((embed_dim,), next(ki)),
    }

    ego = jax.random.normal(next(ki), (bs, num_ego_q, embed_dim), dtype=jnp.float32)
    map_feat = jax.random.normal(next(ki), (bs, num_map, embed_dim), dtype=jnp.float32)
    other_feat = jax.random.normal(next(ki), (bs, num_other, embed_dim), dtype=jnp.float32)
    traj_anchors = jax.random.normal(next(ki), (bs, 6, future_steps, 2), dtype=jnp.float32)
    prediction = jax.random.normal(next(ki), (bs, num_agents, future_steps, 2), dtype=jnp.float32)
    target = jax.random.normal(next(ki), (bs, future_steps, 2), dtype=jnp.float32)

    prep = prepare_params(params)          # one-time weight composition
    out = feature_fusion_forward(prep, ego, map_feat, other_feat,
                                 traj_anchors, prediction, target)
    out = jax.block_until_ready(out)

    ref = _ref_forward(params, ego, map_feat, other_feat,
                       traj_anchors, prediction, target)
    # tolerance covers trace-time weight re-association + pl.reciprocal(approx=True)
    np.testing.assert_allclose(np.asarray(out), np.asarray(ref),
                               rtol=2e-3, atol=2e-3)
    assert out.shape == (bs, num_ego_q, embed_dim)
    print("KERNEL_OK")
</pallas_src>

<mosaic_0001>
module attributes {stable_mosaic.version = 11 : i64} {
  func.func @_fused_feature_fusion_kernel(%arg0: memref<8x32xf32, #tpu.memory_space<vmem>>, %arg1: memref<24x32xf32, #tpu.memory_space<vmem>>, %arg2: memref<16x32xf32, #tpu.memory_space<vmem>>, %arg3: memref<16x16xf32, #tpu.memory_space<vmem>>, %arg4: memref<192x32xf32, #tpu.memory_space<vmem>>, %arg5: memref<8x32xf32, #tpu.memory_space<vmem>>, %arg6: memref<32x128xf32, #tpu.memory_space<vmem>>, %arg7: memref<1x128xf32, #tpu.memory_space<vmem>>, %arg8: memref<32x1xi32, #tpu.memory_space<vmem>>, %arg9: memref<1x56xi32, #tpu.memory_space<vmem>>, %arg10: memref<8x128xf32, #tpu.memory_space<vmem>>) attributes {dimension_semantics = [], scalar_prefetch = 0 : i64, scratch_operands = 0 : i64, tpu.core_type = #tpu.core_type<tc>} {
    %c0 = arith.constant 0 : index
    %c0_0 = arith.constant 0 : index
    %0 = vector.load %arg0[%c0, %c0_0] : memref<8x32xf32, #tpu.memory_space<vmem>>, vector<8x32xf32>
    %c0_1 = arith.constant 0 : index
    %c0_2 = arith.constant 0 : index
    %1 = vector.load %arg4[%c0_1, %c0_2] : memref<192x32xf32, #tpu.memory_space<vmem>>, vector<32x32xf32>
    %cst = arith.constant dense<0.000000e+00> : vector<8x32xf32>
    %2 = tpu.matmul %0, %1, %cst {dimension_numbers = #tpu.dot_dimension_numbers<[1], [0], [0], [1], [0, 0, 1, 1], [], []>} : vector<8x32xf32>, vector<32x32xf32>, vector<8x32xf32> -> vector<8x32xf32>
    %c0_3 = arith.constant 0 : index
    %c0_4 = arith.constant 0 : index
    %3 = vector.load %arg5[%c0_3, %c0_4] : memref<8x32xf32, #tpu.memory_space<vmem>>, vector<1x32xf32>
    %4 = vector.broadcast %3 : vector<1x32xf32> to vector<8x32xf32>
    %5 = arith.addf %2, %4 : vector<8x32xf32>
    %c0_5 = arith.constant 0 : index
    %c0_6 = arith.constant 0 : index
    %6 = vector.load %arg1[%c0_5, %c0_6] : memref<24x32xf32, #tpu.memory_space<vmem>>, vector<24x32xf32>
    %c32 = arith.constant 32 : index
    %c0_7 = arith.constant 0 : index
    %7 = vector.load %arg4[%c32, %c0_7] : memref<192x32xf32, #tpu.memory_space<vmem>>, vector<32x32xf32>
    %cst_8 = arith.constant dense<0.000000e+00> : vector<24x32xf32>
    %8 = tpu.matmul %6, %7, %cst_8 {dimension_numbers = #tpu.dot_dimension_numbers<[1], [0], [0], [1], [0, 0, 1, 1], [], []>} : vector<24x32xf32>, vector<32x32xf32>, vector<24x32xf32> -> vector<24x32xf32>
    %c1 = arith.constant 1 : index
    %c0_9 = arith.constant 0 : index
    %9 = vector.load %arg5[%c1, %c0_9] : memref<8x32xf32, #tpu.memory_space<vmem>>, vector<1x32xf32>
    %10 = vector.broadcast %9 : vector<1x32xf32> to vector<24x32xf32>
    %11 = arith.addf %8, %10 : vector<24x32xf32>
    %c0_10 = arith.constant 0 : index
    %c0_11 = arith.constant 0 : index
    %12 = vector.load %arg2[%c0_10, %c0_11] : memref<16x32xf32, #tpu.memory_space<vmem>>, vector<16x32xf32>
    %c64 = arith.constant 64 : index
    %c0_12 = arith.constant 0 : index
    %13 = vector.load %arg4[%c64, %c0_12] : memref<192x32xf32, #tpu.memory_space<vmem>>, vector<32x32xf32>
    %cst_13 = arith.constant dense<0.000000e+00> : vector<16x32xf32>
    %14 = tpu.matmul %12, %13, %cst_13 {dimension_numbers = #tpu.dot_dimension_numbers<[1], [0], [0], [1], [0, 0, 1, 1], [], []>} : vector<16x32xf32>, vector<32x32xf32>, vector<16x32xf32> -> vector<16x32xf32>
    %c2 = arith.constant 2 : index
    %c0_14 = arith.constant 0 : index
    %15 = vector.load %arg5[%c2, %c0_14] : memref<8x32xf32, #tpu.memory_space<vmem>>, vector<1x32xf32>
    %16 = vector.broadcast %15 : vector<1x32xf32> to vector<16x32xf32>
    %17 = arith.addf %14, %16 : vector<16x32xf32>
    %c0_15 = arith.constant 0 : index
    %c0_16 = arith.constant 0 : index
    %18 = vector.load %arg3[%c0_15, %c0_16] : memref<16x16xf32, #tpu.memory_space<vmem>>, vector<16x16xf32>
    %c96 = arith.constant 96 : index
    %c0_17 = arith.constant 0 : index
    %19 = vector.load %arg4[%c96, %c0_17] : memref<192x32xf32, #tpu.memory_space<vmem>>, vector<16x32xf32>
    %cst_18 = arith.constant dense<0.000000e+00> : vector<16x32xf32>
    %20 = tpu.matmul %18, %19, %cst_18 {dimension_numbers = #tpu.dot_dimension_numbers<[1], [0], [0], [1], [0, 0, 1, 1], [], []>} : vector<16x16xf32>, vector<16x32xf32>, vector<16x32xf32> -> vector<16x32xf32>
    %c3 = arith.constant 3 : index
    %c0_19 = arith.constant 0 : index
    %21 = vector.load %arg5[%c3, %c0_19] : memref<8x32xf32, #tpu.memory_space<vmem>>, vector<1x32xf32>
    %22 = vector.broadcast %21 : vector<1x32xf32> to vector<16x32xf32>
    %23 = arith.addf %20, %22 : vector<16x32xf32>
    %c0_20 = arith.constant 0 : index
    %c0_21 = arith.constant 0 : index
    %24 = vector.load %arg1[%c0_20, %c0_21] : memref<24x32xf32, #tpu.memory_space<vmem>>, vector<24x32xf32>
    %c112 = arith.constant 112 : index
    %c0_22 = arith.constant 0 : index
    %25 = vector.load %arg4[%c112, %c0_22] : memref<192x32xf32, #tpu.memory_space<vmem>>, vector<32x32xf32>
    %cst_23 = arith.constant dense<0.000000e+00> : vector<24x32xf32>
    %26 = tpu.matmul %24, %25, %cst_23 {dimension_numbers = #tpu.dot_dimension_numbers<[1], [0], [0], [1], [0, 0, 1, 1], [], []>} : vector<24x32xf32>, vector<32x32xf32>, vector<24x32xf32> -> vector<24x32xf32>
    %c4 = arith.constant 4 : index
    %c0_24 = arith.constant 0 : index
    %27 = vector.load %arg5[%c4, %c0_24] : memref<8x32xf32, #tpu.memory_space<vmem>>, vector<1x32xf32>
    %28 = vector.broadcast %27 : vector<1x32xf32> to vector<24x32xf32>
    %29 = arith.addf %26, %28 : vector<24x32xf32>
    %c0_25 = arith.constant 0 : index
    %c0_26 = arith.constant 0 : index
    %30 = vector.load %arg2[%c0_25, %c0_26] : memref<16x32xf32, #tpu.memory_space<vmem>>, vector<16x32xf32>
    %c144 = arith.constant 144 : index
    %c0_27 = arith.constant 0 : index
    %31 = vector.load %arg4[%c144, %c0_27] : memref<192x32xf32, #tpu.memory_space<vmem>>, vector<32x32xf32>
    %cst_28 = arith.constant dense<0.000000e+00> : vector<16x32xf32>
    %32 = tpu.matmul %30, %31, %cst_28 {dimension_numbers = #tpu.dot_dimension_numbers<[1], [0], [0], [1], [0, 0, 1, 1], [], []>} : vector<16x32xf32>, vector<32x32xf32>, vector<16x32xf32> -> vector<16x32xf32>
    %c5 = arith.constant 5 : index
    %c0_29 = arith.constant 0 : index
    %33 = vector.load %arg5[%c5, %c0_29] : memref<8x32xf32, #tpu.memory_space<vmem>>, vector<1x32xf32>
    %34 = vector.broadcast %33 : vector<1x32xf32> to vector<16x32xf32>
    %35 = arith.addf %32, %34 : vector<16x32xf32>
    %c0_30 = arith.constant 0 : index
    %c0_31 = arith.constant 0 : index
    %36 = vector.load %arg3[%c0_30, %c0_31] : memref<16x16xf32, #tpu.memory_space<vmem>>, vector<16x16xf32>
    %c176 = arith.constant 176 : index
    %c0_32 = arith.constant 0 : index
    %37 = vector.load %arg4[%c176, %c0_32] : memref<192x32xf32, #tpu.memory_space<vmem>>, vector<16x32xf32>
    %cst_33 = arith.constant dense<0.000000e+00> : vector<16x32xf32>
    %38 = tpu.matmul %36, %37, %cst_33 {dimension_numbers = #tpu.dot_dimension_numbers<[1], [0], [0], [1], [0, 0, 1, 1], [], []>} : vector<16x16xf32>, vector<16x32xf32>, vector<16x32xf32> -> vector<16x32xf32>
    %c6 = arith.constant 6 : index
    %c0_34 = arith.constant 0 : index
    %39 = vector.load %arg5[%c6, %c0_34] : memref<8x32xf32, #tpu.memory_space<vmem>>, vector<1x32xf32>
    %40 = vector.broadcast %39 : vector<1x32xf32> to vector<16x32xf32>
    %41 = arith.addf %38, %40 : vector<16x32xf32>
    %42 = tpu.concatenate %11, %17, %23 in 0 : vector<24x32xf32>, vector<16x32xf32>, vector<16x32xf32> -> vector<56x32xf32>
    %43 = tpu.concatenate %29, %35, %41 in 0 : vector<24x32xf32>, vector<16x32xf32>, vector<16x32xf32> -> vector<56x32xf32>
    %44 = tpu.iota {dimensions = array<i32: 0>} : vector<32x32xi32>
    %45 = tpu.iota {dimensions = array<i32: 1>} : vector<32x32xi32>
    %c0_i32 = arith.constant 0 : i32
    %46 = vector.broadcast %c0_i32 : i32 to vector<32x32xi32>
    %c0_i32_35 = arith.constant 0 : i32
    %47 = vector.broadcast %c0_i32_35 : i32 to vector<32x32xi32>
    %c8_i32 = arith.constant 8 : i32
    %48 = vector.broadcast %c8_i32 : i32 to vector<32x32xi32>
    %49 = arith.cmpi sge, %44, %48 : vector<32x32xi32>
    %50 = arith.extui %49 : vector<32x32xi1> to vector<32x32xi32>
    %51 = arith.addi %46, %50 : vector<32x32xi32>
    %c8_i32_36 = arith.constant 8 : i32
    %52 = vector.broadcast %c8_i32_36 : i32 to vector<32x32xi32>
    %53 = arith.cmpi sge, %45, %52 : vector<32x32xi32>
    %54 = arith.extui %53 : vector<32x32xi1> to vector<32x32xi32>
    %55 = arith.addi %47, %54 : vector<32x32xi32>
    %c16_i32 = arith.constant 16 : i32
    %56 = vector.broadcast %c16_i32 : i32 to vector<32x32xi32>
    %57 = arith.cmpi sge, %44, %56 : vector<32x32xi32>
    %58 = arith.extui %57 : vector<32x32xi1> to vector<32x32xi32>
    %59 = arith.addi %51, %58 : vector<32x32xi32>
    %c16_i32_37 = arith.constant 16 : i32
    %60 = vector.broadcast %c16_i32_37 : i32 to vector<32x32xi32>
    %61 = arith.cmpi sge, %45, %60 : vector<32x32xi32>
    %62 = arith.extui %61 : vector<32x32xi1> to vector<32x32xi32>
    %63 = arith.addi %55, %62 : vector<32x32xi32>
    %c24_i32 = arith.constant 24 : i32
    %64 = vector.broadcast %c24_i32 : i32 to vector<32x32xi32>
    %65 = arith.cmpi sge, %44, %64 : vector<32x32xi32>
    %66 = arith.extui %65 : vector<32x32xi1> to vector<32x32xi32>
    %67 = arith.addi %59, %66 : vector<32x32xi32>
    %c24_i32_38 = arith.constant 24 : i32
    %68 = vector.broadcast %c24_i32_38 : i32 to vector<32x32xi32>
    %69 = arith.cmpi sge, %45, %68 : vector<32x32xi32>
    %70 = arith.extui %69 : vector<32x32xi1> to vector<32x32xi32>
    %71 = arith.addi %63, %70 : vector<32x32xi32>
    %72 = arith.cmpi eq, %67, %71 : vector<32x32xi32>
    %73 = tpu.concatenate %5, %5, %5, %5 in 0 : vector<8x32xf32>, vector<8x32xf32>, vector<8x32xf32>, vector<8x32xf32> -> vector<32x32xf32>
    %cst_39 = arith.constant 0.000000e+00 : f32
    %74 = vector.broadcast %cst_39 : f32 to vector<32x32xf32>
    %75 = arith.select %72, %73, %74 : vector<32x32xi1>, vector<32x32xf32>
    %cst_40 = arith.constant dense<0.000000e+00> : vector<32x56xf32>
    %76 = tpu.matmul %75, %42, %cst_40 {dimension_numbers = #tpu.dot_dimension_numbers<[1], [1], [0], [0], [0, 0, 1, 0], [], []>} : vector<32x32xf32>, vector<56x32xf32>, vector<32x56xf32> -> vector<32x56xf32>
    %c0_41 = arith.constant 0 : index
    %c0_42 = arith.constant 0 : index
    %77 = vector.load %arg8[%c0_41, %c0_42] : memref<32x1xi32, #tpu.memory_space<vmem>>, vector<32x1xi32>
    %c0_43 = arith.constant 0 : index
    %c0_44 = arith.constant 0 : index
    %78 = vector.load %arg9[%c0_43, %c0_44] : memref<1x56xi32, #tpu.memory_space<vmem>>, vector<1x56xi32>
    %79 = vector.broadcast %77 : vector<32x1xi32> to vector<32x56xi32>
    %80 = vector.broadcast %78 : vector<1x56xi32> to vector<32x56xi32>
    %81 = arith.cmpi eq, %79, %80 : vector<32x56xi32>
    %cst_45 = arith.constant -1.000000e+30 : f32
    %82 = vector.broadcast %cst_45 : f32 to vector<32x56xf32>
    %83 = arith.select %81, %76, %82 : vector<32x56xi1>, vector<32x56xf32>
    %cst_46 = arith.constant dense<0xFF800000> : vector<32xf32>
    %84 = vector.multi_reduction <maximumf>, %83, %cst_46 [1] : vector<32x56xf32> to vector<32xf32>
    %85 = vector.shape_cast %84 : vector<32xf32> to vector<32x1xf32>
    %86 = vector.broadcast %85 : vector<32x1xf32> to vector<32x56xf32>
    %87 = arith.subf %83, %86 : vector<32x56xf32>
    %88 = math.exp %87 : vector<32x56xf32>
    %cst_47 = arith.constant dense<0.000000e+00> : vector<32xf32>
    %89 = vector.multi_reduction <add>, %88, %cst_47 [1] : vector<32x56xf32> to vector<32xf32>
    %90 = vector.shape_cast %89 : vector<32xf32> to vector<32x1xf32>
    %cst_48 = arith.constant dense<0.000000e+00> : vector<32x32xf32>
    %91 = tpu.matmul %88, %43, %cst_48 {dimension_numbers = #tpu.dot_dimension_numbers<[1], [0], [0], [1], [0, 0, 1, 1], [], []>} : vector<32x56xf32>, vector<56x32xf32>, vector<32x32xf32> -> vector<32x32xf32>
    %92 = tpu.reciprocal %90 {approx = true} : vector<32x1xf32> -> vector<32x1xf32>
    %93 = vector.broadcast %92 : vector<32x1xf32> to vector<32x32xf32>
    %94 = arith.mulf %91, %93 : vector<32x32xf32>
    %cst_49 = arith.constant 0.000000e+00 : f32
    %95 = vector.broadcast %cst_49 : f32 to vector<32x32xf32>
    %96 = arith.select %72, %94, %95 : vector<32x32xi1>, vector<32x32xf32>
    %97 = vector.extract_strided_slice %96 {offsets = [0, 0], sizes = [8, 32], strides = [1, 1]} : vector<32x32xf32> to vector<8x32xf32>
    %98 = vector.extract_strided_slice %96 {offsets = [8, 0], sizes = [8, 32], strides = [1, 1]} : vector<32x32xf32> to vector<8x32xf32>
    %99 = arith.addf %97, %98 : vector<8x32xf32>
    %100 = vector.extract_strided_slice %96 {offsets = [16, 0], sizes = [8, 32], strides = [1, 1]} : vector<32x32xf32> to vector<8x32xf32>
    %101 = arith.addf %99, %100 : vector<8x32xf32>
    %102 = vector.extract_strided_slice %96 {offsets = [24, 0], sizes = [8, 32], strides = [1, 1]} : vector<32x32xf32> to vector<8x32xf32>
    %103 = arith.addf %101, %102 : vector<8x32xf32>
    %c0_50 = arith.constant 0 : index
    %c0_51 = arith.constant 0 : index
    %104 = vector.load %arg6[%c0_50, %c0_51] : memref<32x128xf32, #tpu.memory_space<vmem>>, vector<32x128xf32>
    %cst_52 = arith.constant dense<0.000000e+00> : vector<8x128xf32>
    %105 = tpu.matmul %103, %104, %cst_52 {dimension_numbers = #tpu.dot_dimension_numbers<[1], [0], [0], [1], [0, 0, 1, 1], [], []>} : vector<8x32xf32>, vector<32x128xf32>, vector<8x128xf32> -> vector<8x128xf32>
    %c0_53 = arith.constant 0 : index
    %c0_54 = arith.constant 0 : index
    %106 = vector.load %arg7[%c0_53, %c0_54] : memref<1x128xf32, #tpu.memory_space<vmem>>, vector<1x128xf32>
    %107 = vector.broadcast %106 : vector<1x128xf32> to vector<8x128xf32>
    %108 = arith.addf %105, %107 : vector<8x128xf32>
    %c0_55 = arith.constant 0 : index
    %c0_56 = arith.constant 0 : index
    %109 = vector.load %arg10[%c0_55, %c0_56] : memref<8x128xf32, #tpu.memory_space<vmem>>, vector<8x128xf32>
    tpu.vector_store %arg10[%c0_55, %c0_56], %108 {strides = array<i32>} : memref<8x128xf32, #tpu.memory_space<vmem>>, vector<8x128xf32>,
    return
  }
}

</mosaic_0001>

<bundles_post_ra>
// kernel: tpu_custom_call.1
= control target key start
LH: loop header
LB: loop body
LE: loop exit
PB: predicated region body
PF: predicated region fallthrough
CT: control target
= control target key end

     0   :  { %v1476_v3 = vmov 0.0|0.0   ;;  %vm1477_vm0 = vmmov 0   ;;  %v1478_v11 = vmov 0.0   ;;  %vm46_vm1 = vcmask 261120   ;;  %s1793_s0 = inlined_call_operand.vmem [shape: f32[8,32], index: 0, kind: input, shape index: {}]   ;;  %s1794_s1 = inlined_call_operand.vmem [shape: f32[24,32], index: 1, kind: input, shape index: {}]   ;;  %s1795_s2 = inlined_call_operand.vmem [shape: f32[16,32], index: 2, kind: input, shape index: {}]   ;;  %s1796_s3 = inlined_call_operand.vmem [shape: f32[16,16], index: 3, kind: input, shape index: {}]   ;;  %s1797_s4 = inlined_call_operand.vmem [shape: f32[192,32], index: 4, kind: input, shape index: {}]   ;;  %s1798_s5 = inlined_call_operand.vmem [shape: f32[8,32], index: 5, kind: input, shape index: {}]   ;;  %s1799_s6 = inlined_call_operand.vmem [shape: f32[32,128], index: 6, kind: input, shape index: {}]   ;;  %s1800_s7 = inlined_call_operand.vmem [shape: f32[1,128], index: 7, kind: input, shape index: {}]   ;;  %s1801_s8 = inlined_call_operand.vmem [shape: s32[32,1], index: 8, kind: input, shape index: {}]   ;;  %s1802_s9 = inlined_call_operand.vmem [shape: s32[1,56], index: 9, kind: input, shape index: {}]   ;;  %s1803_s10 = inlined_call_operand.hbm [shape: f32[8,128], index: 10, kind: output, shape index: {}]  }
   0x1   :  { %v37_v0 = vld [vmem:[%s1797_s4] sm:$0xff]  ;;  %v38_v1 = vld [vmem:[%s1797_s4 + $0x8] sm:$0xff]  ;;  %1351 = vmatprep.subr.bf16.mxu0 %v1476_v3  ;;  %1357 = vmatprep.subr.bf16.mxu1 %v1476_v3  ;;  %v39_v6 = vld [vmem:[%s1797_s4 + $0x10] sm:$0xff] }
   0x2   :  { %v123_v2 = vld [vmem:[%s1797_s4 + $0x20] sm:$0xff]  ;;  %v1352_v4 = vpack.c.bf16 %v38_v1, %v37_v0  ;;  %v124_v5 = vld [vmem:[%s1797_s4 + $0x28] sm:$0xff]  ;;  %v40_v7 = vld [vmem:[%s1797_s4 + $0x18] sm:$0xff]  ;;  %1238 = vmatprep.mubr.msk.f32.mxu1 %vm1477_vm0, %v1478_v11  ;;  %1227 = vmatprep.mubr.msk.f32.mxu0 %vm1477_vm0, %v1478_v11 }
   0x3   :  { %v1358_v8 = vpack.c.bf16 %v124_v5, %v123_v2  ;;  %v125_v9 = vld [vmem:[%s1797_s4 + $0x30] sm:$0xff]  ;;  %v126_v10 = vld [vmem:[%s1797_s4 + $0x38] sm:$0xff]  ;;  %v1355_v12 = vpack.c.bf16 %v40_v7, %v39_v6  ;;  %v223_v13 = vld [vmem:[%s1797_s4 + $0x40] sm:$0xff] }
   0x4   :  { %1353 = vmatpush3.bf16.msra.mxu0 %v1352_v4  ;;  %v224_v14 = vld [vmem:[%s1797_s4 + $0x48] sm:$0xff]  ;;  %v1361_v15 = vpack.c.bf16 %v126_v10, %v125_v9  ;;  %v225_v17 = vld [vmem:[%s1797_s4 + $0x50] sm:$0xff]  ;;  %v226_v18 = vld [vmem:[%s1797_s4 + $0x58] sm:$0xff] }
   0x5   :  { %1359 = vmatpush3.bf16.msra.mxu1 %v1358_v8  ;;  %1354 = vmatprep.subr.bf16.mxu0 %v1476_v3  ;;  %v1363_v16 = vpack.c.bf16 %v224_v14, %v223_v13  ;;  %v36_v19 = vld [vmem:[%s1793_s0] sm:$0xff]  ;;  %v404_v20 = vld [vmem:[%s1797_s4 + $0x70] sm:$0xff]  ;;  %v405_v21 = vld [vmem:[%s1797_s4 + $0x78] sm:$0xff]  ;;  %v1367_v23 = vpack.c.bf16 %v226_v18, %v225_v17 }
   0x6   :  { %1360 = vmatprep.subr.bf16.mxu1 %v1476_v3  ;;  %v120_v22 = vld [vmem:[%s1794_s1] sm:$0xff]  ;;  %v316_v25 = vld [vmem:[%s1797_s4 + $0x68] sm:$0xff]  ;;  %v1376_v26 = vpack.c.bf16 %v405_v21, %v404_v20 }
   0x7   :  { %v315_v24 = vld [vmem:[%s1797_s4 + $0x60] sm:$0xff] }
   0x8   :  { %1356 = vmatpush3.bf16.msra.mxu0 %v1355_v12 }
   0x9   :  { %1362 = vmatpush3.bf16.msra.mxu1 %v1361_v15  ;;  %1364 = vmatprep.subr.bf16.mxu0 %v1363_v16 }
   0xa   :  { %1375 = vmatprep.subr.bf16.mxu1 %v1476_v3 }
   0xb   :  { %15 = vsyncpa [#allocation3], 0  ;;  %1228 = vmatmul.mubr.msk.f32.vlgmr.msra.gmra.mrb[0].mxu0 %vm46_vm1, %v36_v19  ;;  %v221_v27 = vld [vmem:[%s1795_s2] sm:$0xff]  ;;  %v407_v29 = vld [vmem:[%s1797_s4 + $0x88] sm:$0xff]  ;;  %v1371_v31 = vpack.c.bf16 %v316_v25, %v315_v24  ;;  %vm322_vm2 = vcmask 130048   ;;  %v1479_v37 = vmov 0   ;;  %v664_v51 = vlaneseq }
   0xc   :  { %v406_v28 = vld [vmem:[%s1797_s4 + $0x80] sm:$0xff]  ;;  %1239 = vmatmul.mubr.msk.f32.vlgmr.msra.gmra.mrb[0].mxu1 %vm46_vm1, %v120_v22  ;;  %1366 = vmatpush3.bf16.msra.mxu0 %v1363_v16  ;;  %v121_v30 = vld [vmem:[%s1794_s1 + $0x8] sm:$0xff]  ;;  %v122_v34 = vld [vmem:[%s1794_s1 + $0x10] sm:$0xff]  ;;  %vm861_vm13 = vcmask 457728   ;;  %s1480_s17 = smov [#allocation2]  }
   0xd   :  { %1241 = vmatprep.mubr.msk.f32.mxu1 %vm1477_vm0, %v1478_v11  ;;  %1368 = vmatprep.subr.bf16.mxu0 %v1367_v23  ;;  %v1379_v32 = vpack.c.bf16 %v407_v29, %v406_v28  ;;  %v222_v33 = vld [vmem:[%s1795_s2 + $0x8] sm:$0xff]  ;;  %v313_v35 = vld [vmem:[%s1796_s3] sm:$0xff]  ;;  %v493_v38 = vld [vmem:[%s1797_s4 + $0x90] sm:$0xff]  ;;  %v665_v52 = vand.u32 127, %v664_v51  ;;  %s1101_s18 = sshll.u32 %s1480_s17, 4  ;;  %s1102_s18 = int_to_ptr.vmem [resolvable:$true] %s1101_s18 }
   0xe   :  { %1255 = vmatprep.mubr.msk.f32.mxu0 %vm46_vm1, %v221_v27  ;;  %1377 = vmatpush3.bf16.msra.mxu1 %v1376_v26  ;;  %v314_v36 = vld [vmem:[%s1796_s3 + $0x8] sm:$0xff]  ;;  %v494_v39 = vld [vmem:[%s1797_s4 + $0x98] sm:$0xff]  ;;  %v495_v41 = vld [vmem:[%s1797_s4 + $0xa0] sm:$0xff]  ;;  %s1452_s19 = scalar_lea.vmem %s1102_s18, 128  ;;  %p1457_p1 = scmp.lt.s32.totalorder %s1102_s18, %s1102_s18 }
   0xf   :  { %1378 = vmatprep.subr.bf16.mxu1 %v1476_v3  ;;  %1434 = vset.pattern.permute.xlu0 %v1479_v37  ;;  %v1381_v40 = vpack.c.bf16 %v494_v39, %v493_v38  ;;  %v496_v42 = vld [vmem:[%s1797_s4 + $0xa8] sm:$0xff]  ;;  %v832_v44 = vld [vmem:[%s1801_s8] sm:$0xff]  ;;  %v834_v45 = vld [vmem:[%s1801_s8 + $0x10] sm:$0xff]  ;;  %vm674_vm3 = vcmp.ge.s32.totalorder %v665_v52, 8  ;;  %vm688_vm4 = vcmp.ge.s32.totalorder %v665_v52, 16  ;;  %vm703_vm5 = vcmp.ge.s32.totalorder %v665_v52, 24  ;;  %p1453_p0 = scmp.ne.s32.totalorder %s1102_s18, %s1452_s19  ;;  %p1458_p2 = scmp.lt.s32.totalorder %s1452_s19, %s1452_s19 }
  0x10   :  { %1242 = vmatmul.mubr.msk.f32.gmra.mrb[2].mxu1 %vm46_vm1, %v121_v30  ;;  %1370 = vmatpush3.bf16.msra.mxu0 %v1367_v23  ;;  %v1385_v43 = vpack.c.bf16 %v496_v42, %v495_v41  ;;  %v577_v46 = vld [vmem:[%s1797_s4 + $0xb0] sm:$0xff]  ;;  %v578_v47 = vld [vmem:[%s1797_s4 + $0xb8] sm:$0xff]  ;;  %v833_v48 = vld [vmem:[%s1801_s8 + $0x8] sm:$0xff]  ;;  %v675_v53 = vsel %vm674_vm3, 1, %v1479_v37  ;;  %v689_v54 = vsel %vm688_vm4, 1, %v1479_v37  ;;  %v704_v56 = vsel %vm703_vm5, 1, %v1479_v37 }
  0x11   :  { %1372 = vmatprep.subr.bf16.mxu0 %v1371_v31  ;;  %1244 = vmatprep.mubr.msk.f32.mxu1 %vm1477_vm0, %v1478_v11  ;;  %v835_v49 = vld [vmem:[%s1801_s8 + $0x18] sm:$0xff]  ;;  %v1389_v50 = vpack.c.bf16 %v578_v47, %v577_v46  ;;  %v690_v55 = vadd.s32 %v689_v54, %v675_v53  ;;  %v1109_v58 = vld [vmem:[%s1798_s5] ss:$0 sm:$0xff]  ;;  %v1111_v0 = vld [vmem:[%s1798_s5 + $0x1] ss:$0 sm:$0xff]  ;;  %p1459_p3 = por %p1458_p2, %p1457_p1 }
  0x12   :  { %1380 = vmatpush3.bf16.msra.mxu1 %v1379_v32  ;;  %1435 = vset.pattern.permute.xlu1 %v1479_v37  ;;  %vm1693_vm7 = vmpackc.low %vm46_vm1, %vm46_vm1  ;;  %v1115_v8 = vld [vmem:[%s1798_s5 + $0x2] ss:$0 sm:$0xff]  ;;  %v1118_v17 = vld [vmem:[%s1798_s5 + $0x3] ss:$0 sm:$0xff] }
  0x13   :  { %1256 = vmatmul.mubr.msk.f32.vlgmr.msra.gmra.mrb[2].mxu0 %vm46_vm1, %v222_v33  ;;  %838 = vperm.xlu0 %1434, %v832_v44   ;;  %v1679_v57 = vadd.s32 %v704_v56, %v690_v55  ;;  %v1121_v21 = vld [vmem:[%s1798_s5 + $0x4] ss:$0 sm:$0xff]  ;;  %v1125_v39 = vld [vmem:[%s1798_s5 + $0x5] ss:$0 sm:$0xff]  ;;  %v1146_v46 = vld [vmem:[%s1802_s9] ss:$0 sm:$0xff]  ;;  %p1460_p4 = pnand %p1459_p3, %p1453_p0 }
  0x14   :  { %1374 = vmatpush3.bf16.msra.mxu0 %v1371_v31  ;;  %1245 = vmatmul.mubr.msk.f32.gmra.mrb[4].mxu1 %vm46_vm1, %v122_v34 }
  0x15   :  { %1262 = vmatprep.mubr.msk.f32.mxu0 %vm322_vm2, %v313_v35  ;;  %1273 = vmatprep.mubr.msk.f32.mxu1 %vm1477_vm0, %v1478_v11  ;;  %vm1131_vm6 = vcmp.eq.s32.totalorder %v1679_v57, 0  ;;  %vm1132_vm8 = vcmp.eq.s32.totalorder %v1679_v57, 1  ;;  %vm1133_vm9 = vcmp.eq.s32.totalorder %v1679_v57, 2  ;;  %vm1134_vm10 = vcmp.eq.s32.totalorder %v1679_v57, 3 }
  0x16   :  { %1382 = vmatprep.subr.bf16.mxu0 %v1381_v40  ;;  %844 = vperm.xlu1 %1435, %v834_v45  }
  0x17   :  { %1263 = vmatmul.mubr.msk.f32.vlgmr.msra.gmra.mrb[4].mxu0 %vm322_vm2, %v314_v36  ;;  %841 = vperm.xlu0 %1434, %v833_v48  }
  0x18   :  { %1274 = vmatmul.mubr.msk.f32.vlgmr.msra.gmra.mrb[6].mxu1 %vm46_vm1, %v120_v22  ;;  %1290 = vmatprep.mubr.msk.f32.mxu0 %vm46_vm1, %v221_v27 }
  0x19   :  { %1276 = vmatprep.mubr.msk.f32.mxu1 %vm1477_vm0, %v1478_v11  ;;  %1384 = vmatpush3.bf16.msra.mxu0 %v1381_v40 }
  0x1a   :  { %1386 = vmatprep.subr.bf16.mxu0 %v1385_v43  ;;  %847 = vperm.xlu1 %1435, %v835_v49  }
  0x1c   :  { %1277 = vmatmul.mubr.msk.f32.gmra.mrb[8].mxu1 %vm46_vm1, %v121_v30 }
  0x1d   :  { %1279 = vmatprep.mubr.msk.f32.mxu1 %vm1477_vm0, %v1478_v11  ;;  %1388 = vmatpush3.bf16.msra.mxu0 %v1385_v43 }
  0x1e   :  { %1390 = vmatprep.subr.bf16.mxu0 %v1389_v50 }
  0x20   :  { %1280 = vmatmul.mubr.msk.f32.gmra.mrb[10].mxu1 %vm46_vm1, %v122_v34  ;;  %1291 = vmatmul.mubr.msk.f32.vlgmr.msra.gmra.mrb[6].mxu0 %vm46_vm1, %v222_v33 }
  0x21   :  { %1297 = vmatprep.mubr.msk.f32.mxu0 %vm322_vm2, %v313_v35  ;;  %1392 = vmatpush3.bf16.msra.mxu0 %v1389_v50 }
  0x24   :  { %1298 = vmatmul.mubr.msk.f32.vlgmr.msra.gmra.mrb[8].mxu0 %vm322_vm2, %v314_v36 }
  0x92   :  { %v839_v45 = vpop.permute.xlu0 %838 }
  0x93   :  { %vm853_vm12 = vcmp.eq.s32.totalorder %v839_v45, %v1146_v46 }
  0x95   :  { %v845_v48 = vpop.permute.xlu1 %844 }
  0x96   :  { %v842_v47 = vpop.permute.xlu0 %841  ;;  %vm855_vm14 = vcmp.eq.s32.totalorder %v845_v48, %v1146_v46 }
  0x97   :  { %vm854_vm11 = vcmp.eq.s32.totalorder %v842_v47, %v1146_v46 }
  0x99   :  { %v848_v53 = vpop.permute.xlu1 %847 }
  0x9a   :  { %vm856_vm15 = vcmp.eq.s32.totalorder %v848_v53, %v1146_v46 }
  0xde   :  { %v116_v59 = vpop.f32.mrb[0].mxu0 }
  0xdf   :  { %v207_v60 = vpop.f32.mrb[0].mxu1  ;;  %v117_v61 = vadd.f32 %v1109_v58, %v116_v59  ;;  %v1229_v62 = vpop.f32.mrb[1].mxu0 }
  0xe0   :  { %v1240_v63 = vpop.f32.mrb[1].mxu1  ;;  %v208_v4 = vadd.f32 %v1111_v0, %v207_v60 }
  0xe1   :  { %v710_v1 = vsel %vm1131_vm6, %v117_v61, 0.0  ;;  %v711_v36 = vsel %vm1132_vm8, %v117_v61, 0.0  ;;  %v712_v37 = vsel %vm1133_vm9, %v117_v61, 0.0  ;;  %v713_v38 = vsel %vm1134_vm10, %v117_v61, 0.0 }
  0xe2   :  { %1314 = vmatprep.mubr.msk.f32.mxu1 %vm46_vm1, %v710_v1 }
  0xe3   :  { %v212_v2 = vpop.f32.mrb[2].mxu1 }
  0xe4   :  { %v213_v5 = vadd.f32 %v1111_v0, %v212_v2  ;;  %v1243_v6 = vpop.f32.mrb[3].mxu1 }
  0xe6   :  { %v1393_v9 = vpack.c.bf16 %v213_v5, %v208_v4  ;;  %v1257_v10 = vpop.f32.mrb[2].mxu0 }
  0xe7   :  { %v217_v12 = vpop.f32.mrb[4].mxu1  ;;  %v304_v13 = vpop.f32.mrb[3].mxu0  ;;  %v310_v23 = vadd.f32 %v1257_v10, %v1115_v8 }
  0xe8   :  { %1395 = vmatprep.subr.msk.bf16.mxu1 %vm1693_vm7, %v1393_v9  ;;  %v218_v14 = vadd.f32 %v1111_v0, %v217_v12  ;;  %v305_v15 = vadd.f32 %v1115_v8, %v304_v13  ;;  %v1246_v16 = vpop.f32.mrb[5].mxu1  ;;  %v1128_v0 = vld [vmem:[%s1798_s5 + $0x6] ss:$0 sm:$0xff] }
  0xe9   :  { %1398 = vmatpush3.bf16.xpose.msk.msra.mxu1 %vm1693_vm7, %v1393_v9 }
  0xea   :  { %v1399_v18 = vpack.c.bf16 %v305_v15, %v218_v14  ;;  %v1264_v19 = vpop.f32.mrb[4].mxu0 }
  0xeb   :  { %v395_v20 = vpop.f32.mrb[5].mxu0  ;;  %v479_v22 = vpop.f32.mrb[6].mxu1  ;;  %v401_v35 = vadd.f32 %v1264_v19, %v1118_v17 }
  0xec   :  { %v396_v24 = vadd.f32 %v1118_v17, %v395_v20  ;;  %1401 = vmatprep.subr.msk.bf16.mxu1 %vm1693_vm7, %v1399_v18  ;;  %v1275_v25 = vpop.f32.mrb[7].mxu1  ;;  %v480_v27 = vadd.f32 %v1121_v21, %v479_v22 }
  0xee   :  { %v1405_v26 = vpack.c.bf16 %v396_v24, %v310_v23 }
  0xef   :  { %v484_v28 = vpop.f32.mrb[8].mxu1 }
  0xf0   :  { %v485_v29 = vadd.f32 %v1121_v21, %v484_v28  ;;  %v1278_v30 = vpop.f32.mrb[9].mxu1  ;;  %v1011_v28 = vld [vmem:[%s1799_s6 + $0x8] sm:$0xff] }
  0xf1   :  { %1404 = vmatpush3.bf16.xpose.msk.msra.mxu1 %vm1693_vm7, %v1399_v18  ;;  %v1012_v30 = vld [vmem:[%s1799_s6 + $0x10] sm:$0xff] }
  0xf2   :  { %1407 = vmatprep.subr.msk.bf16.mxu1 %vm1693_vm7, %v1405_v26  ;;  %v1411_v31 = vpack.c.bf16 %v485_v29, %v480_v27  ;;  %v1010_v27 = vld [vmem:[%s1799_s6] sm:$0xff] }
  0xf3   :  { %v489_v32 = vpop.f32.mrb[10].mxu1  ;;  %v1292_v40 = vpop.f32.mrb[6].mxu0  ;;  %v1424_v29 = vpack.c.bf16 %v1011_v28, %v1010_v27 }
  0xf4   :  { %1412 = vmatprep.subr.bf16.mxu0 %v1411_v31  ;;  %v490_v33 = vadd.f32 %v1121_v21, %v489_v32  ;;  %v1281_v34 = vpop.f32.mrb[11].mxu1  ;;  %v574_v41 = vadd.f32 %v1292_v40, %v1125_v39  ;;  %v568_v42 = vpop.f32.mrb[7].mxu0 }
  0xf5   :  { %1414 = vmatpush3.bf16.msra.mxu0 %v1411_v31  ;;  %v569_v43 = vadd.f32 %v1125_v39, %v568_v42 }
  0xf7   :  { %v1415_v44 = vpack.c.bf16 %v569_v43, %v490_v33  ;;  %v1299_v63 = vpop.f32.mrb[8].mxu0 }
  0xf8   :  { %v650_v1 = vpop.f32.mrb[9].mxu0  ;;  %v656_v4 = vadd.f32 %v1299_v63, %v1128_v0 }
  0xf9   :  { %1410 = vmatpush3.bf16.xpose.msk.msra.mxu1 %vm1693_vm7, %v1405_v26  ;;  %1416 = vmatprep.subr.bf16.mxu0 %v1415_v44  ;;  %v651_v2 = vadd.f32 %v1128_v0, %v650_v1 }
  0xfa   :  { %1312 = vmatprep.subr.msk.mxu1 %vm46_vm1, %v401_v35  ;;  %1418 = vmatpush3.bf16.msra.mxu0 %v1415_v44 }
  0xfb   :  { %v1419_v5 = vpack.c.bf16 %v651_v2, %v574_v41 }
  0xfd   :  { %1420 = vmatprep.subr.bf16.mxu0 %v1419_v5 }
  0xfe   :  { %1422 = vmatpush3.bf16.msra.mxu0 %v1419_v5 }
  0xff   :  { %1332 = vmatprep.subr.mxu0 %v656_v4 }
 0x101   :  { %1313 = vmatpush3.xpose.msk.msra.mxu1 %vm46_vm1, %v401_v35 }
 0x102   :  { %1333 = vmatpush3.msra.mxu0 %v656_v4 }
 0x103   :  { %1423 = vmatprep.subr.bf16.mxu0 %v1476_v3 }
 0x104   :  { %1315 = vmatmul.mubr.msk.f32.vlgmr.msra.gmra.mrb[12].mxu1 %vm46_vm1, %v711_v36 }
 0x105   :  { %1317 = vmatprep.mubr.msk.f32.mxu1 %vm46_vm1, %v712_v37 }
 0x108   :  { %1318 = vmatmul.mubr.msk.f32.gmra.mrb[14].mxu1 %vm46_vm1, %v713_v38 }
 0x1d7   :  { %v1316_v49 = vpop.f32.mrb[12].mxu1 }
 0x1d8   :  { %v858_v50 = vsel %vm854_vm11, %v1316_v49, -1e+30  ;;  %v813_v51 = vpop.f32.mrb[13].mxu1 }
 0x1d9   :  { %v857_v52 = vsel %vm853_vm12, %v813_v51, -1e+30  ;;  %v865_v54 = vsel %vm861_vm13, %v858_v50, -inf }
 0x1da   :  { %866 = vmax.xlane.f32.xlu1 %v865_v54  ;;  %v862_v55 = vsel %vm861_vm13, %v857_v52, -inf  ;;  %v1151_v54 = vld [vmem:[%s1800_s7] ss:$0 sm:$0xff] }
 0x1db   :  { %863 = vmax.xlane.f32.xlu0 %v862_v55  ;;  %v1319_v56 = vpop.f32.mrb[14].mxu1 }
 0x1dc   :  { %v823_v58 = vpop.f32.mrb[15].mxu1  ;;  %v860_v61 = vsel %vm856_vm15, %v1319_v56, -1e+30 }
 0x1dd   :  { %v859_v59 = vsel %vm855_vm14, %v823_v58, -1e+30  ;;  %v871_v62 = vsel %vm861_vm13, %v860_v61, -inf }
 0x1de   :  { %v868_v60 = vsel %vm861_vm13, %v859_v59, -inf }
 0x1df   :  { %869 = vmax.xlane.f32.xlu0 %v868_v60 }
 0x1e3   :  { %872 = vmax.xlane.f32.xlu0 %v871_v62 }
 0x267   :  { %v867_v6 = vpop.xlane.xlu1 %866 }
 0x268   :  { %v875_v7 = vsub.f32 %v858_v50, %v867_v6  ;;  %v864_v8 = vpop.xlane.xlu0 %863 }
 0x269   :  { %v874_v9 = vsub.f32 %v857_v52, %v864_v8 }
 0x26a   :  { %v880_v10 = vmul.f32 1.442695, %v875_v7 }
 0x26b   :  { %v878_v12 = vmul.f32 1.442695, %v874_v9 }
 0x26c   :  { %1436 = vpow2.f32 %v880_v10  ;;  %v870_v13 = vpop.xlane.xlu0 %869 }
 0x26d   :  { %1438 = vpow2.f32 %v878_v12  ;;  %v876_v14 = vsub.f32 %v859_v59, %v870_v13 }
 0x26f   :  { %v882_v15 = vmul.f32 1.442695, %v876_v14 }
 0x270   :  { %v873_v16 = vpop.xlane.xlu0 %872 }
 0x271   :  { %1440 = vpow2.f32 %v882_v15  ;;  %v877_v17 = vsub.f32 %v860_v61, %v873_v16 }
 0x273   :  { %v884_v18 = vmul.f32 1.442695, %v877_v17 }
 0x275   :  { %1442 = vpow2.f32 %v884_v18 }
 0x276   :  { %v1437_v19 = vpop.eup %1436 }
 0x277   :  { %v1439_v20 = vpop.eup %1438  ;;  %v889_v21 = vsel %vm861_vm13, %v1437_v19, 0.0 }
 0x278   :  { %1334 = vmatprep.mubr.msk.f32.mxu0 %vm861_vm13, %v1439_v20  ;;  %890 = vadd.xlane.f32.xlu0 %v889_v21  ;;  %v886_v22 = vsel %vm861_vm13, %v1439_v20, 0.0 }
 0x279   :  { %1335 = vmatmul.mubr.msk.f32.vlgmr.msra.gmra.mrb[10].mxu0 %vm861_vm13, %v1437_v19  ;;  %887 = vadd.xlane.f32.xlu1 %v886_v22 }
 0x27a   :  { %1425 = vmatpush3.bf16.msra.mxu0 %v1424_v29 }
 0x27b   :  { %v1441_v23 = vpop.eup %1440  ;;  %1426 = vmatprep.subr.bf16.mxu0 %v1476_v3 }
 0x27c   :  { %1337 = vmatprep.mubr.msk.f32.mxu0 %vm861_vm13, %v1441_v23  ;;  %v892_v24 = vsel %vm861_vm13, %v1441_v23, 0.0 }
 0x27d   :  { %893 = vadd.xlane.f32.xlu1 %v892_v24 }
 0x27f   :  { %v1443_v25 = vpop.eup %1442 }
 0x280   :  { %1338 = vmatmul.mubr.msk.f32.gmra.mrb[12].mxu0 %vm861_vm13, %v1443_v25  ;;  %v895_v26 = vsel %vm861_vm13, %v1443_v25, 0.0 }
 0x281   :  { %896 = vadd.xlane.f32.xlu0 %v895_v26  ;;  %1348 = vmatprep.mubr.msk.f32.mxu0 %vm1477_vm0, %v1478_v11  ;;  %v1013_v11 = vld [vmem:[%s1799_s6 + $0x18] sm:$0xff] }
 0x282   :  { %v1427_v31 = vpack.c.bf16 %v1013_v11, %v1012_v30 }
 0x284   :  { %1428 = vmatpush3.bf16.msra.mxu0 %v1427_v31 }
 0x305   :  { %v891_v32 = vpop.xlane.xlu0 %890 }
 0x306   :  { %v888_v33 = vpop.xlane.xlu1 %887  ;;  %1444 = vrcp.f32 %v891_v32 }
 0x307   :  { %1446 = vrcp.f32 %v888_v33 }
 0x30a   :  { %v894_v34 = vpop.xlane.xlu1 %893 }
 0x30b   :  { %1448 = vrcp.f32 %v894_v34 }
 0x30e   :  { %v897_v35 = vpop.xlane.xlu0 %896 }
 0x30f   :  { %1450 = vrcp.f32 %v897_v35 }
 0x310   :  { %v1445_v36 = vpop.eup %1444 }
 0x311   :  { %v1447_v37 = vpop.eup %1446 }
 0x315   :  { %v1449_v44 = vpop.eup %1448 }
 0x319   :  { %v1451_v46 = vpop.eup %1450 }
 0x34c   :  { %v1336_v3 = vpop.f32.mrb[10].mxu0 }
 0x34d   :  { %v1000_v38 = vmul.f32 %v1445_v36, %v1336_v3  ;;  %v976_v39 = vpop.f32.mrb[11].mxu0 }
 0x34e   :  { %v999_v40 = vmul.f32 %v1447_v37, %v976_v39 }
 0x34f   :  { %v1004_v41 = vsel %vm1132_vm8, %v1000_v38, 0.0 }
 0x350   :  { %v1003_v42 = vsel %vm1131_vm6, %v999_v40, 0.0 }
 0x351   :  { %v1007_v43 = vadd.f32 %v1004_v41, %v1003_v42 }
 0x353   :  { %v1339_v45 = vpop.f32.mrb[12].mxu0 }
 0x354   :  { %v986_v47 = vpop.f32.mrb[13].mxu0  ;;  %v1002_v48 = vmul.f32 %v1451_v46, %v1339_v45 }
 0x355   :  { %v1001_v49 = vmul.f32 %v1449_v44, %v986_v47 }
 0x356   :  { %v1006_v52 = vsel %vm1134_vm10, %v1002_v48, 0.0 }
 0x357   :  { %v1005_v50 = vsel %vm1133_vm9, %v1001_v49, 0.0 }
 0x358   :  { %v1008_v51 = vadd.f32 %v1007_v43, %v1005_v50 }
 0x35a   :  { %v1009_v53 = vadd.f32 %v1008_v51, %v1006_v52 }
 0x35c   :  { %1349 = vmatmul.mubr.msk.f32.vlgmr.msra.gmra.mrb[14].mxu0 %vm46_vm1, %v1009_v53 }
 0x42f   :  { %v1090_v55 = vpop.f32.mrb[14].mxu0 }
 0x430   :  { %v1091_v56 = vadd.f32 %v1151_v54, %v1090_v55  ;;  %v1350_v58 = vpop.f32.mrb[15].mxu0 }
 0x432   :  { %1094 = vst [vmem:[#allocation2] sm:$0xff] %v1091_v56 }
 0x433   :  { %1463 = shalt.err (!%p1460_p4)
}
 0x434   :  { %s1464_s20 = scalar_lea.hbm %s1803_s10, 128 }
 0x435   :  { %p1465_p5 = scmp.ne.s32.totalorder %s1803_s10, %s1464_s20  ;;  %p1468_p6 = scmp.lt.u32.totalorder %s1464_s20, %s1803_s10 }
 0x437   :  { %p1470_p7 = pnand %p1468_p6, %p1465_p5 }
 0x439   :  { %1473 = shalt.err (!%p1470_p7)
}
 0x43a   :  { %1104 = dma.vmem_to_hbm [thread:$0]  %s1102_s18, 128, %s1803_s10, [#allocation3]  }
 0x43b   :  { %1474 = dma.done.wait [#allocation3], 128  }
 0x43c   :  { %1475 = vsyncadd [#allocation3], 4294967168 }
 0x43d   :  { %1108 = vsyncpa [#allocation3], 1 }

</bundles_post_ra>
